<compile_context>
chip_gen: v5e
topology: v5e:2x2
jax: 0.10.0
libtpu: 0.0.40
codegen_flags: <defaults>
</compile_context>

<pallas_src>
import functools

import jax
import jax.numpy as jnp
from jax.experimental import pallas as pl
from jax.experimental.pallas import tpu as pltpu


def channel_attention_kernel(x_ref, w1_ref, b1_ref, w2_ref, b2_ref, o_ref,
                             sum_ref, max_ref, *, hw, thw, ns):
    # x_ref: (TB, C, THW); w1: (C, Ch); b1: (1, Ch); w2: (Ch, C); b2: (1, C)
    # sum_ref / max_ref: (TB, C) f32 accumulators (persist across the s axis).
    s = pl.program_id(1)

    @pl.when(s == 0)
    def _init():
        sum_ref[...] = jnp.zeros_like(sum_ref)
        max_ref[...] = jnp.full_like(max_ref, -jnp.inf)

    def _accumulate(x_sum, x_max):
        sum_ref[...] += jnp.sum(x_sum, axis=-1, dtype=jnp.float32)
        max_ref[...] = jnp.maximum(
            max_ref[...], jnp.max(x_max, axis=-1).astype(jnp.float32))

    if hw % thw == 0:
        # All chunks are fully in-bounds: minimal steady-state loop.
        x = x_ref[...]
        _accumulate(x, x)
    else:
        # Last chunk is partially out-of-bounds: mask the padded lanes
        # (0 for the sum, -inf for the max).  Non-last chunks stay unmasked.
        @pl.when(s != ns - 1)
        def _full_chunk():
            x = x_ref[...]
            _accumulate(x, x)

        @pl.when(s == ns - 1)
        def _last_chunk():
            x = x_ref[...]
            lane = jax.lax.broadcasted_iota(jnp.int32, x.shape, dimension=2)
            valid = (lane + s * thw) < hw
            _accumulate(jnp.where(valid, x, jnp.zeros_like(x)),
                        jnp.where(valid, x, jnp.full_like(x, -jnp.inf)))

    @pl.when(s == ns - 1)
    def _finalize():
        avg = sum_ref[...] * (1.0 / float(hw))        # (TB, C)
        mx = max_ref[...]                             # (TB, C)
        tb = avg.shape[0]
        # Fuse the two MLP evaluations into one pass over [avg; max].
        stacked = jnp.concatenate([avg, mx], axis=0)  # (2*TB, C)

        w1 = w1_ref[...].astype(jnp.float32)
        b1 = b1_ref[...].astype(jnp.float32)
        w2 = w2_ref[...].astype(jnp.float32)
        b2 = b2_ref[...].astype(jnp.float32)

        h = jnp.maximum(
            jnp.dot(stacked, w1, preferred_element_type=jnp.float32) + b1, 0.0)
        y = jnp.dot(h, w2, preferred_element_type=jnp.float32) + b2
        out = jax.nn.sigmoid(y[:tb] + y[tb:])
        o_ref[...] = out.astype(o_ref.dtype)


def channel_attention(x, w1, b1, w2, b2, *, batch_tile=None, spatial_tile=None,
                      vmem_tile_budget_bytes=8 * 1024 * 1024):
    """x: (B, C, H, W).  Weights stored transposed: w1 (C, Ch), w2 (Ch, C);
    biases b1 (1, Ch), b2 (1, C).  Returns (B, C, 1, 1)."""
    B, C, H, W = x.shape
    HW = H * W
    hidden = w1.shape[1]
    itemsize = jnp.dtype(x.dtype).itemsize
    x3 = x.reshape(B, C, HW)

    # --- tile selection -----------------------------------------------------
    tb = batch_tile if batch_tile is not None else (B if B <= 8 else 8)
    if spatial_tile is not None:
        thw = int(spatial_tile)
    elif HW <= 128:
        thw = HW                       # full spatial extent, no lane constraint
    else:
        # Lane-aligned spatial chunk, sized so the double-buffered x tile stays
        # well inside the scoped-VMEM budget on every generation
        # (v7x: 64 MiB physical / 32 MiB default scoped is the tight case).
        max_thw = int(pl.cdiv(HW, 128)) * 128
        budget_thw = (vmem_tile_budget_bytes // (tb * C * itemsize)) // 128 * 128
        thw = int(max(128, min(max_thw, budget_thw)))

    nb = int(pl.cdiv(B, tb))
    ns = int(pl.cdiv(HW, thw))

    kernel = functools.partial(channel_attention_kernel, hw=HW, thw=thw, ns=ns)

    cost = pl.CostEstimate(
        flops=int(2 * (2 * B) * C * hidden * 2),      # two tiny matmuls on [avg;max]
        transcendentals=int(B * C),                   # sigmoid
        bytes_accessed=int(B * C * HW * itemsize + B * C * itemsize
                           + (w1.size + b1.size + w2.size + b2.size)
                           * jnp.dtype(w1.dtype).itemsize),
    )

    out = pl.pallas_call(
        kernel,
        out_shape=jax.ShapeDtypeStruct((B, C), x.dtype),
        grid_spec=pltpu.PrefetchScalarGridSpec(
            num_scalar_prefetch=0,
            grid=(nb, ns),                            # reduction (spatial) axis last
            in_specs=[
                pl.BlockSpec((tb, C, thw), lambda b, s: (b, 0, s)),
                pl.BlockSpec((C, hidden), lambda b, s: (0, 0)),
                pl.BlockSpec((1, hidden), lambda b, s: (0, 0)),
                pl.BlockSpec((hidden, C), lambda b, s: (0, 0)),
                pl.BlockSpec((1, C), lambda b, s: (0, 0)),
            ],
            out_specs=pl.BlockSpec((tb, C), lambda b, s: (b, 0)),
            scratch_shapes=[
                pltpu.VMEM((tb, C), jnp.float32),     # running sum
                pltpu.VMEM((tb, C), jnp.float32),     # running max
            ],
        ),
        compiler_params=pltpu.CompilerParams(
            dimension_semantics=("parallel", "arbitrary"),
            vmem_limit_bytes=32 * 1024 * 1024,
        ),
        cost_estimate=cost,
    )(x3, w1, b1, w2, b2)

    return out.reshape(B, C, 1, 1)


def reference(x, w1, b1, w2, b2):
    """Plain-JAX reference matching the PyTorch module semantics."""
    avg = jnp.mean(x, axis=(2, 3))
    mx = jnp.max(x, axis=(2, 3))

    def fc(v):
        return jnp.maximum(v @ w1 + b1, 0.0) @ w2 + b2

    return jax.nn.sigmoid(fc(avg) + fc(mx)).reshape(x.shape[0], x.shape[1], 1, 1)


if __name__ == "__main__":
    def make_case(key, B, C, H, W, reduction_ratio=16):
        hidden = max(1, C // reduction_ratio)
        kx, k1, k2, k3, k4 = jax.random.split(key, 5)
        x = jax.random.normal(kx, (B, C, H, W), dtype=jnp.float32)
        # nn.Linear(C, hidden): weight (hidden, C) -> stored transposed (C, hidden)
        w1 = jax.random.normal(k1, (C, hidden), dtype=jnp.float32) * 0.1
        b1 = jax.random.normal(k2, (1, hidden), dtype=jnp.float32) * 0.1
        w2 = jax.random.normal(k3, (hidden, C), dtype=jnp.float32) * 0.1
        b2 = jax.random.normal(k4, (1, C), dtype=jnp.float32) * 0.1
        return x, w1, b1, w2, b2

    key = jax.random.PRNGKey(0)
    key1, key2 = jax.random.split(key)

    # Case 1: HW = 256 divisible by the spatial tile -> streams two full chunks.
    x, w1, b1, w2, b2 = make_case(key1, B=2, C=32, H=16, W=16)
    out = channel_attention(x, w1, b1, w2, b2, spatial_tile=128)
    jax.block_until_ready(out)
    ref = reference(x, w1, b1, w2, b2)
    assert out.shape == (2, 32, 1, 1), out.shape
    assert jnp.allclose(out, ref, atol=1e-5, rtol=1e-5), (
        float(jnp.max(jnp.abs(out - ref))))

    # Case 2: HW = 196 (not a multiple of 128) -> exercises the masked last chunk.
    x, w1, b1, w2, b2 = make_case(key2, B=2, C=32, H=14, W=14)
    out = channel_attention(x, w1, b1, w2, b2, spatial_tile=128)
    jax.block_until_ready(out)
    ref = reference(x, w1, b1, w2, b2)
    assert out.shape == (2, 32, 1, 1), out.shape
    assert jnp.allclose(out, ref, atol=1e-5, rtol=1e-5), (
        float(jnp.max(jnp.abs(out - ref))))

    print("KERNEL_OK")
</pallas_src>

<mosaic_0001>
module attributes {stable_mosaic.version = 11 : i64} {
  func.func @channel_attention_kernel(%arg0: i32, %arg1: i32, %arg2: memref<2x32x128xf32, #tpu.memory_space<vmem>>, %arg3: memref<32x2xf32, #tpu.memory_space<vmem>>, %arg4: memref<1x2xf32, #tpu.memory_space<vmem>>, %arg5: memref<2x32xf32, #tpu.memory_space<vmem>>, %arg6: memref<1x32xf32, #tpu.memory_space<vmem>>, %arg7: memref<2x32xf32, #tpu.memory_space<vmem>>, %arg8: memref<2x32xf32, #tpu.memory_space<vmem>>, %arg9: memref<2x32xf32, #tpu.memory_space<vmem>>) attributes {dimension_semantics = [#tpu.dimension_semantics<parallel>, #tpu.dimension_semantics<arbitrary>], iteration_bounds = array<i64: 1, 2>, scalar_prefetch = 0 : i64, scratch_operands = 2 : i64, tpu.core_type = #tpu.core_type<tc>, window_params = [{transform_indices = @transform_0, window_bounds = array<i64: 2, 32, 128>}, {pipeline_mode = #tpu.pipeline_mode<synchronous>, transform_indices = @transform_1, window_bounds = array<i64: 32, 2>}, {pipeline_mode = #tpu.pipeline_mode<synchronous>, transform_indices = @transform_2, window_bounds = array<i64: 1, 2>}, {pipeline_mode = #tpu.pipeline_mode<synchronous>, transform_indices = @transform_3, window_bounds = array<i64: 2, 32>}, {pipeline_mode = #tpu.pipeline_mode<synchronous>, transform_indices = @transform_4, window_bounds = array<i64: 1, 32>}, {transform_indices = @transform_5, window_bounds = array<i64: 2, 32>}]} {
    %c0_i32 = arith.constant 0 : i32
    %0 = arith.cmpi eq, %arg1, %c0_i32 : i32
    %1 = arith.extui %0 : i1 to i32
    %c0_i32_0 = arith.constant 0 : i32
    %2 = arith.cmpi ne, %1, %c0_i32_0 : i32
    scf.if %2 {
      %cst_13 = arith.constant 0.000000e+00 : f32
      %15 = vector.broadcast %cst_13 : f32 to vector<2x32xf32>
      %c0_14 = arith.constant 0 : index
      %c0_15 = arith.constant 0 : index
      %16 = vector.load %arg8[%c0_14, %c0_15] : memref<2x32xf32, #tpu.memory_space<vmem>>, vector<2x32xf32>
      tpu.vector_store %arg8[%c0_14, %c0_15], %15 {strides = array<i32>} : memref<2x32xf32, #tpu.memory_space<vmem>>, vector<2x32xf32>,
      %cst_16 = arith.constant 0xFF800000 : f32
      %17 = vector.broadcast %cst_16 : f32 to vector<2x32xf32>
      %c0_17 = arith.constant 0 : index
      %c0_18 = arith.constant 0 : index
      %18 = vector.load %arg9[%c0_17, %c0_18] : memref<2x32xf32, #tpu.memory_space<vmem>>, vector<2x32xf32>
      tpu.vector_store %arg9[%c0_17, %c0_18], %17 {strides = array<i32>} : memref<2x32xf32, #tpu.memory_space<vmem>>, vector<2x32xf32>,
    } else {
    }
    %c0 = arith.constant 0 : index
    %c0_1 = arith.constant 0 : index
    %c0_2 = arith.constant 0 : index
    %3 = vector.load %arg2[%c0, %c0_1, %c0_2] : memref<2x32x128xf32, #tpu.memory_space<vmem>>, vector<2x32x128xf32>
    %c0_3 = arith.constant 0 : index
    %c0_4 = arith.constant 0 : index
    %4 = vector.load %arg8[%c0_3, %c0_4] : memref<2x32xf32, #tpu.memory_space<vmem>>, vector<2x32xf32>
    %cst = arith.constant dense<0.000000e+00> : vector<2x32xf32>
    %5 = vector.multi_reduction <add>, %3, %cst [2] : vector<2x32x128xf32> to vector<2x32xf32>
    %6 = arith.addf %4, %5 : vector<2x32xf32>
    %c0_5 = arith.constant 0 : index
    %c0_6 = arith.constant 0 : index
    %7 = vector.load %arg8[%c0_5, %c0_6] : memref<2x32xf32, #tpu.memory_space<vmem>>, vector<2x32xf32>
    tpu.vector_store %arg8[%c0_5, %c0_6], %6 {strides = array<i32>} : memref<2x32xf32, #tpu.memory_space<vmem>>, vector<2x32xf32>,
    %c0_7 = arith.constant 0 : index
    %c0_8 = arith.constant 0 : index
    %8 = vector.load %arg9[%c0_7, %c0_8] : memref<2x32xf32, #tpu.memory_space<vmem>>, vector<2x32xf32>
    %cst_9 = arith.constant dense<0xFF800000> : vector<2x32xf32>
    %9 = vector.multi_reduction <maximumf>, %3, %cst_9 [2] : vector<2x32x128xf32> to vector<2x32xf32>
    %10 = arith.maximumf %8, %9 : vector<2x32xf32>
    %c0_10 = arith.constant 0 : index
    %c0_11 = arith.constant 0 : index
    %11 = vector.load %arg9[%c0_10, %c0_11] : memref<2x32xf32, #tpu.memory_space<vmem>>, vector<2x32xf32>
    tpu.vector_store %arg9[%c0_10, %c0_11], %10 {strides = array<i32>} : memref<2x32xf32, #tpu.memory_space<vmem>>, vector<2x32xf32>,
    %c1_i32 = arith.constant 1 : i32
    %12 = arith.cmpi eq, %arg1, %c1_i32 : i32
    %13 = arith.extui %12 : i1 to i32
    %c0_i32_12 = arith.constant 0 : i32
    %14 = arith.cmpi ne, %13, %c0_i32_12 : i32
    scf.if %14 {
      %c0_13 = arith.constant 0 : index
      %c0_14 = arith.constant 0 : index
      %15 = vector.load %arg8[%c0_13, %c0_14] : memref<2x32xf32, #tpu.memory_space<vmem>>, vector<2x32xf32>
      %cst_15 = arith.constant 3.906250e-03 : f32
      %16 = vector.broadcast %cst_15 : f32 to vector<2x32xf32>
      %17 = arith.mulf %15, %16 : vector<2x32xf32>
      %c0_16 = arith.constant 0 : index
      %c0_17 = arith.constant 0 : index
      %18 = vector.load %arg9[%c0_16, %c0_17] : memref<2x32xf32, #tpu.memory_space<vmem>>, vector<2x32xf32>
      %19 = tpu.concatenate %17, %18 in 0 : vector<2x32xf32>, vector<2x32xf32> -> vector<4x32xf32>
      %c0_18 = arith.constant 0 : index
      %c0_19 = arith.constant 0 : index
      %20 = vector.load %arg3[%c0_18, %c0_19] : memref<32x2xf32, #tpu.memory_space<vmem>>, vector<32x2xf32>
      %c0_20 = arith.constant 0 : index
      %c0_21 = arith.constant 0 : index
      %21 = vector.load %arg4[%c0_20, %c0_21] : memref<1x2xf32, #tpu.memory_space<vmem>>, vector<1x2xf32>
      %c0_22 = arith.constant 0 : index
      %c0_23 = arith.constant 0 : index
      %22 = vector.load %arg5[%c0_22, %c0_23] : memref<2x32xf32, #tpu.memory_space<vmem>>, vector<2x32xf32>
      %c0_24 = arith.constant 0 : index
      %c0_25 = arith.constant 0 : index
      %23 = vector.load %arg6[%c0_24, %c0_25] : memref<1x32xf32, #tpu.memory_space<vmem>>, vector<1x32xf32>
      %cst_26 = arith.constant dense<0.000000e+00> : vector<4x2xf32>
      %24 = tpu.matmul %19, %20, %cst_26 {dimension_numbers = #tpu.dot_dimension_numbers<[1], [0], [0], [1], [0, 0, 1, 1], [], []>} : vector<4x32xf32>, vector<32x2xf32>, vector<4x2xf32> -> vector<4x2xf32>
      %25 = vector.broadcast %21 : vector<1x2xf32> to vector<4x2xf32>
      %26 = arith.addf %24, %25 : vector<4x2xf32>
      %cst_27 = arith.constant 0.000000e+00 : f32
      %27 = vector.broadcast %cst_27 : f32 to vector<4x2xf32>
      %28 = arith.maximumf %26, %27 : vector<4x2xf32>
      %cst_28 = arith.constant dense<0.000000e+00> : vector<4x32xf32>
      %29 = tpu.matmul %28, %22, %cst_28 {dimension_numbers = #tpu.dot_dimension_numbers<[1], [0], [0], [1], [0, 0, 1, 1], [], []>} : vector<4x2xf32>, vector<2x32xf32>, vector<4x32xf32> -> vector<4x32xf32>
      %30 = vector.broadcast %23 : vector<1x32xf32> to vector<4x32xf32>
      %31 = arith.addf %29, %30 : vector<4x32xf32>
      %32 = vector.extract_strided_slice %31 {offsets = [0, 0], sizes = [2, 32], strides = [1, 1]} : vector<4x32xf32> to vector<2x32xf32>
      %33 = vector.extract_strided_slice %31 {offsets = [2, 0], sizes = [2, 32], strides = [1, 1]} : vector<4x32xf32> to vector<2x32xf32>
      %34 = arith.addf %32, %33 : vector<2x32xf32>
      %35 = arith.negf %34 : vector<2x32xf32>
      %36 = math.exp %35 : vector<2x32xf32>
      %cst_29 = arith.constant 1.000000e+00 : f32
      %37 = vector.broadcast %cst_29 : f32 to vector<2x32xf32>
      %38 = arith.addf %37, %36 : vector<2x32xf32>
      %39 = arith.divf %37, %38 : vector<2x32xf32>
      %c0_30 = arith.constant 0 : index
      %c0_31 = arith.constant 0 : index
      %40 = vector.load %arg7[%c0_30, %c0_31] : memref<2x32xf32, #tpu.memory_space<vmem>>, vector<2x32xf32>
      tpu.vector_store %arg7[%c0_30, %c0_31], %39 {strides = array<i32>} : memref<2x32xf32, #tpu.memory_space<vmem>>, vector<2x32xf32>,
    } else {
    }
    return
  }
  func.func @transform_0(%arg0: i32, %arg1: i32) -> (i32, i32, i32) {
    %c0_i32 = arith.constant 0 : i32
    %c0_i32_0 = arith.constant 0 : i32
    return %arg0, %c0_i32, %arg1 : i32, i32, i32
  }
  func.func @transform_1(%arg0: i32, %arg1: i32) -> (i32, i32) {
    %c0_i32 = arith.constant 0 : i32
    %c0_i32_0 = arith.constant 0 : i32
    %c0_i32_1 = arith.constant 0 : i32
    return %c0_i32, %c0_i32_0 : i32, i32
  }
  func.func @transform_2(%arg0: i32, %arg1: i32) -> (i32, i32) {
    %c0_i32 = arith.constant 0 : i32
    %c0_i32_0 = arith.constant 0 : i32
    %c0_i32_1 = arith.constant 0 : i32
    return %c0_i32, %c0_i32_0 : i32, i32
  }
  func.func @transform_3(%arg0: i32, %arg1: i32) -> (i32, i32) {
    %c0_i32 = arith.constant 0 : i32
    %c0_i32_0 = arith.constant 0 : i32
    %c0_i32_1 = arith.constant 0 : i32
    return %c0_i32, %c0_i32_0 : i32, i32
  }
  func.func @transform_4(%arg0: i32, %arg1: i32) -> (i32, i32) {
    %c0_i32 = arith.constant 0 : i32
    %c0_i32_0 = arith.constant 0 : i32
    %c0_i32_1 = arith.constant 0 : i32
    return %c0_i32, %c0_i32_0 : i32, i32
  }
  func.func @transform_5(%arg0: i32, %arg1: i32) -> (i32, i32) {
    %c0_i32 = arith.constant 0 : i32
    %c0_i32_0 = arith.constant 0 : i32
    return %arg0, %c0_i32 : i32, i32
  }
}

</mosaic_0001>

<bundles_post_ra>
// kernel: tpu_custom_call.1
= control target key start
LH: loop header
LB: loop body
LE: loop exit
PB: predicated region body
PF: predicated region fallthrough
CT: control target
= control target key end

     0   :  { %10 = vsyncpa [#allocation5], 0  ;;  %s911_s0 = inlined_call_operand.hbm [shape: f32[2,32,256], index: 0, kind: input, shape index: {}]   ;;  %s912_s1 = inlined_call_operand.vmem [shape: f32[32,2], index: 1, kind: input, shape index: {}]   ;;  %s913_s2 = inlined_call_operand.vmem [shape: f32[1,2], index: 2, kind: input, shape index: {}]   ;;  %s914_s3 = inlined_call_operand.vmem [shape: f32[2,32], index: 3, kind: input, shape index: {}]   ;;  %s915_s4 = inlined_call_operand.vmem [shape: f32[1,32], index: 4, kind: input, shape index: {}]   ;;  %s916_s5 = inlined_call_operand.hbm [shape: f32[2,32], index: 5, kind: output, shape index: {}]  }
   0x1   :  { %12 = vsyncpa [#allocation5 + $0x1], 0 }
   0x2   :  { %13 = vsyncpa [#allocation6], 0  ;;  %s781_s18 = smov 0   ;;  %s783_s19 = smov 0  }
   0x3   :  { %s785_s20 = smov 0   ;;  %s787_s21 = smov 0  }
   0x4   :  { %s789_s22 = smov 0   ;;  %s791_s23 = smov 0  }
   0x5 LB: > { %s541_s24 = sadd.s32 4294967295, %s743_s23   ;;  %s28_s25 = sadd.s32 1, %s739_s22  ;;  %s743_s23 = sphi %s791_s23, %s19_s23   ;;  %s739_s22 = sphi %s789_s22, %s923_s22   ;;  %s735_s21 = sphi %s787_s21, %s922_s21   ;;  %s731_s20 = sphi %s785_s20, %s921_s20   ;;  %s727_s19 = sphi %s783_s19, %s920_s19   ;;  %s723_s18 = sphi %s781_s18, %s919_s18  }
   0x6   : > { %p29_p0 = scmp.ge.s32.totalorder %s28_s25, 2  ;;  %s40_s26 = sadd.s32 1, %s731_s20 }
   0x7   : > { %p47_p1 = scmp.ne.s32.totalorder %s731_s20, %s727_s19  ;;  %p48_p2 = scmp.eq.s32.totalorder %s743_s23, 0 }
   0x8   : > { %s925_s25 = smov (%p29_p0, %s28_s25), 0  ;;  %p53_p4 = scmp.ne.s32.totalorder %s727_s19, %s723_s18 }
   0x9   : > { %p817_p3 = por %p48_p2, %p47_p1  ;;  %s36_s28 = ssub.s32 %s739_s22, %s925_s25 }
   0xa   : > { %p54_p5 = scmp.eq.s32.totalorder %s541_s24, 0  ;;  %p38_p6 = scmp.eq.s32.totalorder %s36_s28, 0 }
   0xb   : > { %p568_p8 = scmp.lt.s32.totalorder %s743_s23, 2  ;;  %s199_s6 = sand.u32 1, %s731_s20  }
   0xc   : > { %p826_p7 = por %p54_p5, %p53_p4  ;;  %s545_s7 = sshll.u32 %s739_s22, 3 }
   0xd   : > { %s832_s30 = scalar_select %p38_p6, %s731_s20, %s40_s26  }
   0xe   : > { %s544_s8 = sshll.u32 %s199_s6, 6  ;;  %s210_s11 = scalar_lea.hbm %s911_s0, %s545_s7 }
   0xf   : > { %s211_s12 = sshll.u32 %s210_s11, 4  ;;  %s203_s13 = scalar_lea.vmem [#allocation4], %s544_s8  ;;  %s212_s12 = int_to_ptr.hbm [resolvable:$true] %s211_s12 }
  0x10   : > { %s213_s14 = sshll.u32 %s203_s13, 4  ;;  %p565_p9 = pnand %p568_p8, %p817_p3  ;;  %s214_s14 = int_to_ptr.vmem [resolvable:$true] %s213_s14 }
  0x11   : > { %p546_p10 = scmp.ge.s32.totalorder %s743_s23, 1  ;;  %s200_s15 = scalar_lea.sflag [#allocation5], %s199_s6 }
  0x12   : > { %s745_s16 = smov 256   ;;  %s746_s17 = smov 128  }
  0x13   : > { %s747_s18 = smov 8   ;;  %p221_p11 = scmp.lt.s32.totalorder %s743_s23, 3 }
  0x14   : > { %567 = dma.hbm_to_vmem [thread:$0]  (!%p565_p9), %s212_s12, 1024, %s214_s14, %s200_s15, %s745_s16, %s746_s17, %s747_s18  }
  0x15   : > { %p222_p12 = pnand %p546_p10, %p221_p11 }
  0x16   : > { %s227_s26 = sand.u32 (!%p222_p12), 1, %s727_s19  }
  0x17   : > { %225 = sbr.rel (%p222_p12) target bundleno = 511 (0x1ff), region = 40  ;;  %s547_s28 = sshll.u32 (!%p222_p12), %s227_s26, 6 }
  0x18   : > { %s228_s7 = scalar_lea.sflag (!%p222_p12), [#allocation5], %s227_s26  ;;  %s231_s8 = scalar_lea.vmem (!%p222_p12), [#allocation4], %s547_s28 }
  0x1c   : > { %714 = dma.done.wait (%p826_p7), %s228_s7, 1024  }
  0x1d   : > { %716 = vsyncadd (%p826_p7), %s228_s7, 4294966272  ;;  %p548_p13 = scmp.ne.s32.totalorder %s735_s21, 0 }
  0x1f   : > { %258 = sbr.rel (%p548_p13) target bundleno = 39 (0x27), region = 48 }
  0x24   : > { %vm259_vm0 = vcmask 254976   ;;  %v748_v0 = vmov 0.0   ;;  %v749_v1 = vmov -inf  }
  0x25   : > { %260 = vst.msk [vmem:[#allocation2] sm:$0x3] %vm259_vm0, %v748_v0 }
  0x26   : > { %261 = vst.msk [vmem:[#allocation3] sm:$0x3] %vm259_vm0, %v749_v1 }
  0x27 PF: > { %v266_v2 = vld [vmem:[%s231_s8 + $0x20] sm:$0xff]  ;;  %v267_v4 = vld [vmem:[%s231_s8 + $0x28] sm:$0xff]  ;;  %v264_v6 = vld [vmem:[%s231_s8 + $0x10] sm:$0xff]  ;;  %v295_v19 = vlaneseq  ;;  %vm300_vm1 = vcmask 130112   ;;  %vm304_vm2 = vcmask 195712   ;;  %vm308_vm3 = vcmask 261312  }
  0x28   : > { %v262_v3 = vld [vmem:[%s231_s8] sm:$0xff]  ;;  %279 = vadd.xlane.f32.xlu1 %v266_v2  ;;  %v263_v5 = vld [vmem:[%s231_s8 + $0x8] sm:$0xff]  ;;  %v268_v7 = vld [vmem:[%s231_s8 + $0x30] sm:$0xff]  ;;  %vm317_vm4 = vcmask 1041409   ;;  %vm321_vm5 = vcmask 254976   ;;  %p549_p0 = scmp.ne.s32.totalorder %s735_s21, 1 }
  0x29   : > { %324 = vmax.xlane.f32.xlu2 %v262_v3  ;;  %271 = vadd.xlane.f32.xlu0 %v262_v3  ;;  %v269_v8 = vld [vmem:[%s231_s8 + $0x38] sm:$0xff]  ;;  %v296_v20 = vand.u32 127, %v295_v19 }
  0x2a   : > { %v265_v9 = vld [vmem:[%s231_s8 + $0x18] sm:$0xff] }
  0x2b   : > { %v298_v22 = vadd.s32 4294967288, %v296_v20  ;;  %v302_v24 = vadd.s32 4294967280, %v296_v20  ;;  %v306_v28 = vadd.s32 4294967272, %v296_v20 }
  0x2c   : > { %v270_v42 = vld [vmem:[#allocation2] sm:$0x3] }
  0x2d   : > { %v323_v60 = vld [vmem:[#allocation3] sm:$0x3] }
  0x30   : > { %281 = vadd.xlane.f32.xlu1 %v267_v4 }
  0x31   : > { %326 = vmax.xlane.f32.xlu2 %v263_v5  ;;  %273 = vadd.xlane.f32.xlu0 %v263_v5 }
  0x38   : > { %334 = vmax.xlane.f32.xlu1 %v267_v4 }
  0x39   : > { %275 = vadd.xlane.f32.xlu2 %v264_v6  ;;  %332 = vmax.xlane.f32.xlu0 %v266_v2 }
  0x40   : > { %328 = vmax.xlane.f32.xlu1 %v264_v6 }
  0x41   : > { %336 = vmax.xlane.f32.xlu2 %v268_v7  ;;  %283 = vadd.xlane.f32.xlu0 %v268_v7 }
  0x48   : > { %285 = vadd.xlane.f32.xlu1 %v269_v8 }
  0x49   : > { %330 = vmax.xlane.f32.xlu2 %v265_v9  ;;  %277 = vadd.xlane.f32.xlu0 %v265_v9 }
  0x51   : > { %338 = vmax.xlane.f32.xlu0 %v269_v8 }
  0x9b   : > { %v280_v10 = vpop.xlane.xlu1 %279 }
  0x9c   : > { %v325_v11 = vpop.xlane.xlu2 %324  ;;  %v272_v12 = vpop.xlane.xlu0 %271  ;;  %v310_v26 = vperm.slane %v280_v10, %v296_v20 }
  0x9d   : > { %v297_v32 = vperm.slane %v272_v12, %v296_v20  ;;  %v348_v44 = vperm.slane %v325_v11, %v296_v20 }
  0xa3   : > { %v282_v13 = vpop.xlane.xlu1 %281 }
  0xa4   : > { %v327_v14 = vpop.xlane.xlu2 %326  ;;  %v274_v15 = vpop.xlane.xlu0 %273  ;;  %v311_v27 = vperm.slane %v282_v13, %v298_v22 }
  0xa5   : > { %v299_v29 = vperm.slane %v274_v15, %v298_v22  ;;  %v349_v47 = vperm.slane %v327_v14, %v298_v22 }
  0xa6   : > { %v312_v34 = vsel %vm300_vm1, %v311_v27, %v310_v26 }
  0xa7   : > { %v301_v37 = vsel %vm300_vm1, %v299_v29, %v297_v32  ;;  %v350_v55 = vsel %vm300_vm1, %v349_v47, %v348_v44 }
  0xab   : > { %v335_v16 = vpop.xlane.xlu1 %334 }
  0xac   : > { %v276_v17 = vpop.xlane.xlu2 %275  ;;  %v333_v18 = vpop.xlane.xlu0 %332  ;;  %v356_v48 = vperm.slane %v335_v16, %v298_v22 }
  0xad   : > { %v303_v31 = vperm.slane %v276_v17, %v302_v24  ;;  %v355_v49 = vperm.slane %v333_v18, %v296_v20 }
  0xaf   : > { %v305_v40 = vsel %vm304_vm2, %v303_v31, %v301_v37  ;;  %v357_v56 = vsel %vm300_vm1, %v356_v48, %v355_v49 }
  0xb3   : > { %v329_v21 = vpop.xlane.xlu1 %328 }
  0xb4   : > { %v284_v23 = vpop.xlane.xlu0 %283  ;;  %v337_v25 = vpop.xlane.xlu2 %336  ;;  %v351_v51 = vperm.slane %v329_v21, %v302_v24 }
  0xb5   : > { %v313_v30 = vperm.slane %v284_v23, %v302_v24  ;;  %v358_v52 = vperm.slane %v337_v25, %v302_v24 }
  0xb6   : > { %v352_v58 = vsel %vm304_vm2, %v351_v51, %v350_v55 }
  0xb7   : > { %v314_v38 = vsel %vm304_vm2, %v313_v30, %v312_v34  ;;  %v359_v59 = vsel %vm304_vm2, %v358_v52, %v357_v56 }
  0xbb   : > { %v286_v33 = vpop.xlane.xlu1 %285 }
  0xbc   : > { %v315_v35 = vperm.slane %v286_v33, %v306_v28  ;;  %v278_v36 = vpop.xlane.xlu0 %277  ;;  %v331_v45 = vpop.xlane.xlu2 %330 }
  0xbd   : > { %v307_v39 = vperm.slane %v278_v36, %v306_v28  ;;  %v353_v53 = vperm.slane %v331_v45, %v306_v28 }
  0xbe   : > { %v316_v41 = vsel %vm308_vm3, %v315_v35, %v314_v38 }
  0xbf   : > { %v309_v43 = vsel %vm308_vm3, %v307_v39, %v305_v40  ;;  %v354_v61 = vsel %vm308_vm3, %v353_v53, %v352_v58 }
  0xc0   : > { %v318_v46 = vsel %vm317_vm4, %v316_v41, %v309_v43 }
  0xc1   : > { %v320_v50 = vadd.f32 %v318_v46, %v270_v42 }
  0xc3   : > { %322 = vst.msk [vmem:[#allocation2] sm:$0x3] %vm321_vm5, %v320_v50 }
  0xc4   : > { %v339_v54 = vpop.xlane.xlu0 %338 }
  0xc5   : > { %v360_v57 = vperm.slane %v339_v54, %v306_v28 }
  0xc7   : > { %v361_v62 = vsel %vm308_vm3, %v360_v57, %v359_v59  ;;  %369 = sbr.rel (%p549_p0) target bundleno = 505 (0x1f9), region = 52 }
  0xc8   : > { %v362_v63 = vsel %vm317_vm4, %v361_v62, %v354_v61 }
  0xc9   : > { %v364_v0 = vmax.f32 %v323_v60, %v362_v63 }
  0xcb   : > { %365 = vst.msk [vmem:[#allocation3] sm:$0x3] %vm321_vm5, %v364_v0 }
  0xcc   : > { %v381_v1 = vld [vmem:[%s912_s1 + $0x18] sm:$0xff]  ;;  %v380_v2 = vld [vmem:[%s912_s1 + $0x10] sm:$0xff]  ;;  %v370_v3 = vld [vmem:[#allocation2] sm:$0x3]  ;;  %vm376_vm6 = vcmask 1041408   ;;  %vm388_vm7 = vcmask 261120  }
  0xcd   : > { %404 = vmatpush.msra.mxu0 %v381_v1  ;;  %v379_v5 = vld [vmem:[%s912_s1 + $0x8] sm:$0xff]  ;;  %v371_v6 = vmul.f32 0.00390625, %v370_v3  ;;  %v378_v8 = vld [vmem:[%s912_s1] sm:$0xff]  ;;  %vm416_vm8 = vcmask 15360  }
  0xce   : > { %v383_v10 = vld [vmem:[%s914_s3] sm:$0x3] }
  0xcf   : > { %405 = vmatpush.msra.mxu0 %v380_v2  ;;  %551 = vmatpush.msk.msra.mxu1 %vm376_vm6, %v383_v10  ;;  %v625_v11 = vld [vmem:[%s913_s2] ss:$0 sm:$0xff] }
  0xd0   : > { %v626_v15 = vld [vmem:[%s915_s4] ss:$0 sm:$0xff] }
  0xd1   : > { %406 = vmatpush.msra.mxu0 %v379_v5 }
  0xd2   : > { %v372_v4 = vld [vmem:[#allocation3] sm:$0x3] }
  0xd3   : > { %v374_v7 = vrot.slane %v372_v4, 6  ;;  %407 = vmatpush.msra.mxu0 %v378_v8 }
  0xd5   : > { %v377_v9 = vsel %vm376_vm6, %v371_v6, %v374_v7 }
  0xd6   : > { %550 = vmatmul.msk.f32.vlgmr.msra.gmra.mxu0 %vm388_vm7, %v377_v9 }
 0x153   : > { %v409_v12 = vpop.f32.mrf.mxu0 }
 0x154   : > { %v410_v13 = vadd.f32 %v625_v11, %v409_v12 }
 0x156   : > { %v412_v14 = vmax.f32 %v410_v13, 0.0 }
 0x158   : > { %552 = vmatmul.msk.f32.vlgmr.msra.gmra.mxu1 %vm416_vm8, %v412_v14 }
 0x1d5   : > { %v440_v16 = vpop.f32.mrf.mxu1 }
 0x1d6   : > { %v441_v17 = vadd.f32 %v626_v15, %v440_v16 }
 0x1d8   : > { %v444_v18 = vrot.slane %v441_v17, 2 }
 0x1da   : > { %v446_v19 = vadd.f32 %v444_v18, %v441_v17 }
 0x1dc   : > { %v553_v20 = vmul.f32 -1.442695, %v446_v19 }
 0x1de   : > { %627 = vpow2.f32 %v553_v20 }
 0x1e4   : > { %v628_v21 = vpop.eup %627 }
 0x1e5   : > { %v450_v22 = vadd.f32 1.0, %v628_v21 }
 0x1e7   : > { %629 = vrcp.f32 %v450_v22  ;;  %v462_v26 = vand.u32 2147483648, %v450_v22  ;;  %v460_v28 = vand.u32 2147483647, %v450_v22  ;;  %vm456_vm10 = vweird.f32 %v450_v22 }
 0x1e9   : > { %v463_v30 = vor.u32 1.1754944e-38, %v462_v26  ;;  %vm461_vm12 = vcmp.eq.f32.partialorder %v460_v28, 8.507059e+37 }
 0x1ed   : > { %v630_v23 = vpop.eup %629 }
 0x1ee   : > { %v452_v24 = vmul.f32 %v630_v23, %v450_v22  ;;  %vm457_vm9 = vweird.f32 %v630_v23 }
 0x1ef   : > { %vm458_vm11 = vmor %vm456_vm10, %vm457_vm9 }
 0x1f0   : > { %v453_v25 = vsub.f32 1.0, %v452_v24 }
 0x1f2   : > { %v454_v27 = vmul.f32 %v630_v23, %v453_v25 }
 0x1f4   : > { %v455_v29 = vadd.f32 %v630_v23, %v454_v27 }
 0x1f6   : > { %v459_v31 = vsel %vm458_vm11, %v630_v23, %v455_v29 }
 0x1f7   : > { %v464_v32 = vsel %vm461_vm12, %v463_v30, %v459_v31 }
 0x1f8   : > { %466 = vst.msk [vmem:[#allocation7] sm:$0x3] %vm321_vm5, %v464_v32 }
 0x1f9 PF: > { %p569_p1 = scmp.eq.s32.totalorder %s541_s24, 1  ;;  %s477_s7 = sshll.u32 %s916_s5, 4  ;;  %s478_s7 = int_to_ptr.hbm [resolvable:$true] %s477_s7 }
 0x1fa   : > { %s750_s8 = smov [#allocation7]  }
 0x1fb   : > { %s475_s27 = sshll.u32 %s750_s8, 4  ;;  %s476_s27 = int_to_ptr.vmem [resolvable:$true] %s475_s27 }
 0x1fc   : > { %561 = dma.vmem_to_hbm [thread:$0]  (%p569_p1), %s476_s27, 32, %s478_s7, [#allocation6]  }
 0x1fd   : > { %718 = dma.done.wait (%p569_p1), [#allocation6], 32  }
 0x1fe   : > { %720 = vsyncadd (%p569_p1), [#allocation6], 4294967264 }
 0x1ff PF: > { %s19_s23 = sadd.s32 1, %s743_s23   ;;  %s919_s18 = smov %s727_s19 }
 0x200   : > { %p16_p2 = scmp.ge.s32.totalorder %s19_s23, 4   ;;  %s920_s19 = smov %s731_s20 }
 0x201   : > { %s921_s20 = smov %s832_s30  ;;  %s922_s21 = smov %s739_s22 }
 0x202   : > { %s923_s22 = smov %s925_s25  ;;  %18 = sbr.rel (!%p16_p2) target bundleno = 5 (0x5), region = 86 }
 0x207   :  { %491 = vsyncpa [#allocation5], 1 }
 0x208   :  { %493 = vsyncpa [#allocation5 + $0x1], 1 }
 0x209   :  { %494 = vsyncpa [#allocation6], 1 }
 0x20a   :  { %496 = vsyncpa [#allocation6 + $0x1], 1 }

</bundles_post_ra>
